<compile_context>
chip_gen: v5e
topology: v5e:2x2
jax: 0.10.0
libtpu: 0.0.40
codegen_flags: <defaults>
</compile_context>

<pallas_src>
import functools

import jax
import jax.numpy as jnp
from jax.experimental import pallas as pl
from jax.experimental.pallas import tpu as pltpu

SELECTED_LAYERS = (3, 6, 9, 12)          # static, as in the PyTorch module
NUM_SELECTED = len(SELECTED_LAYERS)


def _round_up(x, m):
    return (x + m - 1) // m * m


def _mood_mlp_kernel(src_ref,
                     w1_ref, b1_ref,
                     w2_ref, b2_ref,
                     w3_ref, b3_ref,
                     wo_ref, bo_ref,
                     o_ref):
    """Fused: layer gather/flatten + 3x(Linear+ReLU) + final Linear."""
    # ---- fused layer gather + flatten: [layer3 | layer6 | layer9 | layer12]
    x = jnp.concatenate([src_ref[:, l, :] for l in SELECTED_LAYERS], axis=-1)

    # ---- MLP: bf16 operands into the MXU, f32 accumulation -----------------
    h = x.astype(jnp.bfloat16)
    h = jnp.dot(h, w1_ref[...], preferred_element_type=jnp.float32) + b1_ref[...]
    h = jnp.maximum(h, 0.0).astype(jnp.bfloat16)          # Dropout = identity (eval)

    h = jnp.dot(h, w2_ref[...], preferred_element_type=jnp.float32) + b2_ref[...]
    h = jnp.maximum(h, 0.0).astype(jnp.bfloat16)

    h = jnp.dot(h, w3_ref[...], preferred_element_type=jnp.float32) + b3_ref[...]
    h = jnp.maximum(h, 0.0).astype(jnp.bfloat16)

    out = jnp.dot(h, wo_ref[...], preferred_element_type=jnp.float32) + bo_ref[...]
    o_ref[...] = out.astype(o_ref.dtype)


def init_params(key, d_model, output_size, num_layers=3):
    """Deterministic synthetic parameters. Weights stored as (in, out) f32."""
    feat = NUM_SELECTED * d_model
    dims = [(feat, feat)] * num_layers + [(feat, output_size)]
    params = []
    for fin, fout in dims:
        key, kw, kb = jax.random.split(key, 3)
        bound = 1.0 / jnp.sqrt(fin)
        w = jax.random.uniform(kw, (fin, fout), jnp.float32, -bound, bound)
        b = jax.random.uniform(kb, (1, fout), jnp.float32, -bound, bound)
        params.append((w, b))
    return params


def prepare_params(params, output_size):
    """One-time prep: bf16 weights, lane-dense (128-padded) output head."""
    (w1, b1), (w2, b2), (w3, b3), (wo, bo) = params
    n_pad = _round_up(max(output_size, 1), 128)
    extra = n_pad - wo.shape[1]
    wo_p = jnp.pad(wo, ((0, 0), (0, extra))).astype(jnp.bfloat16)
    bo_p = jnp.pad(bo, ((0, 0), (0, extra)))
    return (w1.astype(jnp.bfloat16), b1,
            w2.astype(jnp.bfloat16), b2,
            w3.astype(jnp.bfloat16), b3,
            wo_p, bo_p)


@functools.partial(jax.jit, static_argnames=("d_model", "output_size", "batch_tile"))
def music_mood_forward(source, prepared, d_model, output_size, batch_tile=512):
    """source: (B, L, d_model) with L >= 13. Returns (B, output_size) f32."""
    w1, b1, w2, b2, w3, b3, wo, bo = prepared
    B, num_hl, dm = source.shape
    assert dm == d_model and num_hl > max(SELECTED_LAYERS)
    feat = NUM_SELECTED * d_model
    n_pad = wo.shape[1]

    # Only stream the hidden-layer slots we actually need (rounded to a
    # sublane multiple so the BlockSpec stays (8,128)-legal).
    needed = max(SELECTED_LAYERS) + 1
    if num_hl <= needed:
        layer_blk = num_hl
    else:
        layer_blk = min(num_hl, _round_up(needed, 8))

    # Batch tiling: big tiles, ragged last tile handled by Pallas (no HBM pad
    # copy of the source).  Output buffer covers grid*tm rows so stores are
    # always full blocks; extra rows are sliced off below.
    tm = min(batch_tile, _round_up(B, 8))
    grid_b = pl.cdiv(B, tm)
    out_rows = grid_b * tm

    # Explicit scoped-VMEM budget (weights resident + double-buffered I/O).
    src_item = jnp.dtype(source.dtype).itemsize
    w_bytes = (3 * feat * feat + feat * n_pad) * 2            # bf16 weights
    b_bytes = (3 * feat + n_pad) * 4                          # f32 biases
    io_bytes = 2 * tm * (layer_blk * d_model * src_item + n_pad * 4)
    act_bytes = 6 * tm * max(feat, n_pad) * 4                 # in-kernel temps
    vmem_limit = int(min(max(2 * (w_bytes + b_bytes + io_bytes + act_bytes),
                             32 * 1024 * 1024),
                         64 * 1024 * 1024))

    def resident(shape):
        # Constant index_map: block stays VMEM-resident across grid steps.
        return pl.BlockSpec(shape, lambda i: (0,) * len(shape))

    out = pl.pallas_call(
        _mood_mlp_kernel,
        out_shape=jax.ShapeDtypeStruct((out_rows, n_pad), jnp.float32),
        grid=(grid_b,),
        in_specs=[
            pl.BlockSpec((tm, layer_blk, d_model), lambda i: (i, 0, 0)),
            resident((feat, feat)), resident((1, feat)),
            resident((feat, feat)), resident((1, feat)),
            resident((feat, feat)), resident((1, feat)),
            resident((feat, n_pad)), resident((1, n_pad)),
        ],
        out_specs=pl.BlockSpec((tm, n_pad), lambda i: (i, 0)),
        compiler_params=pltpu.CompilerParams(
            dimension_semantics=("parallel",),
            vmem_limit_bytes=vmem_limit),
    )(source, w1, b1, w2, b2, w3, b3, wo, bo)

    return out[:B, :output_size]


def reference_forward(source, prepared, output_size):
    """Pure-JAX reference using the same prepared (bf16) parameters."""
    w1, b1, w2, b2, w3, b3, wo, bo = prepared
    x = jnp.concatenate([source[:, l, :] for l in SELECTED_LAYERS], axis=-1)
    h = x.astype(jnp.float32).astype(jnp.bfloat16)
    for w, b in ((w1, b1), (w2, b2), (w3, b3)):
        h = jnp.dot(h, w, preferred_element_type=jnp.float32) + b
        h = jnp.maximum(h, 0.0).astype(jnp.bfloat16)
    out = jnp.dot(h, wo, preferred_element_type=jnp.float32) + bo
    return out[:, :output_size]


if __name__ == "__main__":
    # Small shapes consistent with the module:
    #   d_model = 32  -> flattened feature dim = 4 * 32 = 128 (lane-aligned)
    #   output_size = 8 (padded to 128 lanes inside), batch = 2
    #   source has 13 hidden-layer slots so index 12 is valid.
    d_model = 32
    output_size = 8
    batch = 2
    num_hidden_layers = 13

    key = jax.random.PRNGKey(0)
    key, ksrc = jax.random.split(key)
    source = jax.random.normal(ksrc, (batch, num_hidden_layers, d_model),
                               dtype=jnp.float32)

    params = init_params(key, d_model, output_size, num_layers=3)
    prepared = prepare_params(params, output_size)

    y = music_mood_forward(source, prepared, d_model, output_size)
    y = jax.block_until_ready(y)

    y_ref = reference_forward(source, prepared, output_size)

    assert y.shape == (batch, output_size), y.shape
    assert jnp.all(jnp.isfinite(y))
    assert jnp.allclose(y, y_ref, rtol=2e-2, atol=2e-2), \
        float(jnp.max(jnp.abs(y - y_ref)))
    print("KERNEL_OK")
</pallas_src>

<mosaic_0001>
module attributes {stable_mosaic.version = 11 : i64} {
  func.func @_mood_mlp_kernel(%arg0: i32, %arg1: memref<8x13x32xf32, #tpu.memory_space<vmem>>, %arg2: memref<128x128xbf16, #tpu.memory_space<vmem>>, %arg3: memref<1x128xf32, #tpu.memory_space<vmem>>, %arg4: memref<128x128xbf16, #tpu.memory_space<vmem>>, %arg5: memref<1x128xf32, #tpu.memory_space<vmem>>, %arg6: memref<128x128xbf16, #tpu.memory_space<vmem>>, %arg7: memref<1x128xf32, #tpu.memory_space<vmem>>, %arg8: memref<128x128xbf16, #tpu.memory_space<vmem>>, %arg9: memref<1x128xf32, #tpu.memory_space<vmem>>, %arg10: memref<8x128xf32, #tpu.memory_space<vmem>>) attributes {dimension_semantics = [#tpu.dimension_semantics<parallel>], iteration_bounds = array<i64: 1>, scalar_prefetch = 0 : i64, scratch_operands = 0 : i64, tpu.core_type = #tpu.core_type<tc>, window_params = [{transform_indices = @transform_0, window_bounds = array<i64: 8, 13, 32>}, {pipeline_mode = #tpu.pipeline_mode<synchronous>, transform_indices = @transform_1, window_bounds = array<i64: 128, 128>}, {pipeline_mode = #tpu.pipeline_mode<synchronous>, transform_indices = @transform_2, window_bounds = array<i64: 1, 128>}, {pipeline_mode = #tpu.pipeline_mode<synchronous>, transform_indices = @transform_3, window_bounds = array<i64: 128, 128>}, {pipeline_mode = #tpu.pipeline_mode<synchronous>, transform_indices = @transform_4, window_bounds = array<i64: 1, 128>}, {pipeline_mode = #tpu.pipeline_mode<synchronous>, transform_indices = @transform_5, window_bounds = array<i64: 128, 128>}, {pipeline_mode = #tpu.pipeline_mode<synchronous>, transform_indices = @transform_6, window_bounds = array<i64: 1, 128>}, {pipeline_mode = #tpu.pipeline_mode<synchronous>, transform_indices = @transform_7, window_bounds = array<i64: 128, 128>}, {pipeline_mode = #tpu.pipeline_mode<synchronous>, transform_indices = @transform_8, window_bounds = array<i64: 1, 128>}, {transform_indices = @transform_9, window_bounds = array<i64: 8, 128>}]} {
    %c0 = arith.constant 0 : index
    %c3 = arith.constant 3 : index
    %c0_0 = arith.constant 0 : index
    %0 = vector.load %arg1[%c0, %c3, %c0_0] : memref<8x13x32xf32, #tpu.memory_space<vmem>>, vector<8x1x32xf32>
    %1 = vector.shape_cast %0 : vector<8x1x32xf32> to vector<8x32xf32>
    %c0_1 = arith.constant 0 : index
    %c6 = arith.constant 6 : index
    %c0_2 = arith.constant 0 : index
    %2 = vector.load %arg1[%c0_1, %c6, %c0_2] : memref<8x13x32xf32, #tpu.memory_space<vmem>>, vector<8x1x32xf32>
    %3 = vector.shape_cast %2 : vector<8x1x32xf32> to vector<8x32xf32>
    %c0_3 = arith.constant 0 : index
    %c9 = arith.constant 9 : index
    %c0_4 = arith.constant 0 : index
    %4 = vector.load %arg1[%c0_3, %c9, %c0_4] : memref<8x13x32xf32, #tpu.memory_space<vmem>>, vector<8x1x32xf32>
    %5 = vector.shape_cast %4 : vector<8x1x32xf32> to vector<8x32xf32>
    %c0_5 = arith.constant 0 : index
    %c12 = arith.constant 12 : index
    %c0_6 = arith.constant 0 : index
    %6 = vector.load %arg1[%c0_5, %c12, %c0_6] : memref<8x13x32xf32, #tpu.memory_space<vmem>>, vector<8x1x32xf32>
    %7 = vector.shape_cast %6 : vector<8x1x32xf32> to vector<8x32xf32>
    %8 = tpu.concatenate %1, %3, %5, %7 in 1 : vector<8x32xf32>, vector<8x32xf32>, vector<8x32xf32>, vector<8x32xf32> -> vector<8x128xf32>
    %9 = arith.truncf %8 : vector<8x128xf32> to vector<8x128xbf16>
    %c0_7 = arith.constant 0 : index
    %c0_8 = arith.constant 0 : index
    %10 = vector.load %arg2[%c0_7, %c0_8] : memref<128x128xbf16, #tpu.memory_space<vmem>>, vector<128x128xbf16>
    %cst = arith.constant dense<0.000000e+00> : vector<8x128xf32>
    %11 = tpu.matmul %9, %10, %cst {dimension_numbers = #tpu.dot_dimension_numbers<[1], [0], [0], [1], [0, 0, 1, 1], [], []>} : vector<8x128xbf16>, vector<128x128xbf16>, vector<8x128xf32> -> vector<8x128xf32>
    %c0_9 = arith.constant 0 : index
    %c0_10 = arith.constant 0 : index
    %12 = vector.load %arg3[%c0_9, %c0_10] : memref<1x128xf32, #tpu.memory_space<vmem>>, vector<1x128xf32>
    %13 = vector.broadcast %12 : vector<1x128xf32> to vector<8x128xf32>
    %14 = arith.addf %11, %13 : vector<8x128xf32>
    %cst_11 = arith.constant 0.000000e+00 : f32
    %15 = vector.broadcast %cst_11 : f32 to vector<8x128xf32>
    %16 = arith.maximumf %14, %15 : vector<8x128xf32>
    %17 = arith.truncf %16 : vector<8x128xf32> to vector<8x128xbf16>
    %c0_12 = arith.constant 0 : index
    %c0_13 = arith.constant 0 : index
    %18 = vector.load %arg4[%c0_12, %c0_13] : memref<128x128xbf16, #tpu.memory_space<vmem>>, vector<128x128xbf16>
    %cst_14 = arith.constant dense<0.000000e+00> : vector<8x128xf32>
    %19 = tpu.matmul %17, %18, %cst_14 {dimension_numbers = #tpu.dot_dimension_numbers<[1], [0], [0], [1], [0, 0, 1, 1], [], []>} : vector<8x128xbf16>, vector<128x128xbf16>, vector<8x128xf32> -> vector<8x128xf32>
    %c0_15 = arith.constant 0 : index
    %c0_16 = arith.constant 0 : index
    %20 = vector.load %arg5[%c0_15, %c0_16] : memref<1x128xf32, #tpu.memory_space<vmem>>, vector<1x128xf32>
    %21 = vector.broadcast %20 : vector<1x128xf32> to vector<8x128xf32>
    %22 = arith.addf %19, %21 : vector<8x128xf32>
    %cst_17 = arith.constant 0.000000e+00 : f32
    %23 = vector.broadcast %cst_17 : f32 to vector<8x128xf32>
    %24 = arith.maximumf %22, %23 : vector<8x128xf32>
    %25 = arith.truncf %24 : vector<8x128xf32> to vector<8x128xbf16>
    %c0_18 = arith.constant 0 : index
    %c0_19 = arith.constant 0 : index
    %26 = vector.load %arg6[%c0_18, %c0_19] : memref<128x128xbf16, #tpu.memory_space<vmem>>, vector<128x128xbf16>
    %cst_20 = arith.constant dense<0.000000e+00> : vector<8x128xf32>
    %27 = tpu.matmul %25, %26, %cst_20 {dimension_numbers = #tpu.dot_dimension_numbers<[1], [0], [0], [1], [0, 0, 1, 1], [], []>} : vector<8x128xbf16>, vector<128x128xbf16>, vector<8x128xf32> -> vector<8x128xf32>
    %c0_21 = arith.constant 0 : index
    %c0_22 = arith.constant 0 : index
    %28 = vector.load %arg7[%c0_21, %c0_22] : memref<1x128xf32, #tpu.memory_space<vmem>>, vector<1x128xf32>
    %29 = vector.broadcast %28 : vector<1x128xf32> to vector<8x128xf32>
    %30 = arith.addf %27, %29 : vector<8x128xf32>
    %cst_23 = arith.constant 0.000000e+00 : f32
    %31 = vector.broadcast %cst_23 : f32 to vector<8x128xf32>
    %32 = arith.maximumf %30, %31 : vector<8x128xf32>
    %33 = arith.truncf %32 : vector<8x128xf32> to vector<8x128xbf16>
    %c0_24 = arith.constant 0 : index
    %c0_25 = arith.constant 0 : index
    %34 = vector.load %arg8[%c0_24, %c0_25] : memref<128x128xbf16, #tpu.memory_space<vmem>>, vector<128x128xbf16>
    %cst_26 = arith.constant dense<0.000000e+00> : vector<8x128xf32>
    %35 = tpu.matmul %33, %34, %cst_26 {dimension_numbers = #tpu.dot_dimension_numbers<[1], [0], [0], [1], [0, 0, 1, 1], [], []>} : vector<8x128xbf16>, vector<128x128xbf16>, vector<8x128xf32> -> vector<8x128xf32>
    %c0_27 = arith.constant 0 : index
    %c0_28 = arith.constant 0 : index
    %36 = vector.load %arg9[%c0_27, %c0_28] : memref<1x128xf32, #tpu.memory_space<vmem>>, vector<1x128xf32>
    %37 = vector.broadcast %36 : vector<1x128xf32> to vector<8x128xf32>
    %38 = arith.addf %35, %37 : vector<8x128xf32>
    %c0_29 = arith.constant 0 : index
    %c0_30 = arith.constant 0 : index
    %39 = vector.load %arg10[%c0_29, %c0_30] : memref<8x128xf32, #tpu.memory_space<vmem>>, vector<8x128xf32>
    tpu.vector_store %arg10[%c0_29, %c0_30], %38 {strides = array<i32>} : memref<8x128xf32, #tpu.memory_space<vmem>>, vector<8x128xf32>,
    return
  }
  func.func @transform_0(%arg0: i32) -> (i32, i32, i32) {
    %c0_i32 = arith.constant 0 : i32
    %c0_i32_0 = arith.constant 0 : i32
    %c0_i32_1 = arith.constant 0 : i32
    return %arg0, %c0_i32, %c0_i32_0 : i32, i32, i32
  }
  func.func @transform_1(%arg0: i32) -> (i32, i32) {
    %c0_i32 = arith.constant 0 : i32
    %c0_i32_0 = arith.constant 0 : i32
    %c0_i32_1 = arith.constant 0 : i32
    return %c0_i32, %c0_i32_0 : i32, i32
  }
  func.func @transform_2(%arg0: i32) -> (i32, i32) {
    %c0_i32 = arith.constant 0 : i32
    %c0_i32_0 = arith.constant 0 : i32
    %c0_i32_1 = arith.constant 0 : i32
    return %c0_i32, %c0_i32_0 : i32, i32
  }
  func.func @transform_3(%arg0: i32) -> (i32, i32) {
    %c0_i32 = arith.constant 0 : i32
    %c0_i32_0 = arith.constant 0 : i32
    %c0_i32_1 = arith.constant 0 : i32
    return %c0_i32, %c0_i32_0 : i32, i32
  }
  func.func @transform_4(%arg0: i32) -> (i32, i32) {
    %c0_i32 = arith.constant 0 : i32
    %c0_i32_0 = arith.constant 0 : i32
    %c0_i32_1 = arith.constant 0 : i32
    return %c0_i32, %c0_i32_0 : i32, i32
  }
  func.func @transform_5(%arg0: i32) -> (i32, i32) {
    %c0_i32 = arith.constant 0 : i32
    %c0_i32_0 = arith.constant 0 : i32
    %c0_i32_1 = arith.constant 0 : i32
    return %c0_i32, %c0_i32_0 : i32, i32
  }
  func.func @transform_6(%arg0: i32) -> (i32, i32) {
    %c0_i32 = arith.constant 0 : i32
    %c0_i32_0 = arith.constant 0 : i32
    %c0_i32_1 = arith.constant 0 : i32
    return %c0_i32, %c0_i32_0 : i32, i32
  }
  func.func @transform_7(%arg0: i32) -> (i32, i32) {
    %c0_i32 = arith.constant 0 : i32
    %c0_i32_0 = arith.constant 0 : i32
    %c0_i32_1 = arith.constant 0 : i32
    return %c0_i32, %c0_i32_0 : i32, i32
  }
  func.func @transform_8(%arg0: i32) -> (i32, i32) {
    %c0_i32 = arith.constant 0 : i32
    %c0_i32_0 = arith.constant 0 : i32
    %c0_i32_1 = arith.constant 0 : i32
    return %c0_i32, %c0_i32_0 : i32, i32
  }
  func.func @transform_9(%arg0: i32) -> (i32, i32) {
    %c0_i32 = arith.constant 0 : i32
    %c0_i32_0 = arith.constant 0 : i32
    return %arg0, %c0_i32 : i32, i32
  }
}

</mosaic_0001>

<bundles_post_ra>
// kernel: music_mood_forward.1
= control target key start
LH: loop header
LB: loop body
LE: loop exit
PB: predicated region body
PF: predicated region fallthrough
CT: control target
= control target key end

     0   :  { %14 = vsyncpa [#allocation3], 0  ;;  %s1168_s0 = inlined_call_operand.vmem [shape: f32[2,13,32], index: 0, kind: input, shape index: {}]   ;;  %s1169_s1 = inlined_call_operand.hbm [shape: bf16[128,128], index: 1, kind: input, shape index: {}]   ;;  %s1170_s2 = inlined_call_operand.hbm [shape: f32[1,128], index: 2, kind: input, shape index: {}]   ;;  %s1171_s3 = inlined_call_operand.hbm [shape: bf16[128,128], index: 3, kind: input, shape index: {}]   ;;  %s1172_s4 = inlined_call_operand.hbm [shape: f32[1,128], index: 4, kind: input, shape index: {}]   ;;  %s1173_s5 = inlined_call_operand.hbm [shape: bf16[128,128], index: 5, kind: input, shape index: {}]   ;;  %s1174_s6 = inlined_call_operand.hbm [shape: f32[1,128], index: 6, kind: input, shape index: {}]   ;;  %s1175_s7 = inlined_call_operand.vmem [shape: bf16[128,128], index: 7, kind: input, shape index: {}]   ;;  %s1176_s8 = inlined_call_operand.vmem [shape: f32[1,128], index: 8, kind: input, shape index: {}]   ;;  %s1177_s9 = inlined_call_operand.vmem [shape: f32[8,128], index: 9, kind: output, shape index: {}]  }
   0x1   :  { %15 = vsyncpa [#allocation5], 0 }
   0x2   :  { %16 = vsyncpa [#allocation8], 0  ;;  %s38_s11 = sshll.u32 %s1170_s2, 4  ;;  %s39_s11 = int_to_ptr.hbm [resolvable:$true] %s38_s11 }
   0x3   :  { %17 = vsyncpa [#allocation11], 0  ;;  %s929_s12 = smov [#allocation4]   ;;  %s62_s16 = sshll.u32 %s1172_s4, 4  ;;  %s63_s16 = int_to_ptr.hbm [resolvable:$true] %s62_s16 }
   0x4   :  { %s40_s13 = sshll.u32 %s929_s12, 4  ;;  %s930_s17 = smov [#allocation7]   ;;  %s41_s13 = int_to_ptr.vmem [resolvable:$true] %s40_s13 }
   0x5   :  { %43 = dma.hbm_to_vmem [thread:$0]  %s39_s11, 16, %s41_s13, [#allocation5]  }
   0x6   :  { %s64_s18 = sshll.u32 %s930_s17, 4  ;;  %s24_s21 = sshll.u32 %s1169_s1, 4  ;;  %s65_s18 = int_to_ptr.vmem [resolvable:$true] %s64_s18  ;;  %s25_s21 = int_to_ptr.hbm [resolvable:$true] %s24_s21 }
   0x7   :  { %67 = dma.hbm_to_vmem [thread:$0]  %s63_s16, 16, %s65_s18, [#allocation8]  }
   0x8   :  { %s931_s2 = smov [#allocation2]   ;;  %s48_s25 = sshll.u32 %s1171_s3, 4  ;;  %s49_s25 = int_to_ptr.hbm [resolvable:$true] %s48_s25 }
   0x9   :  { %s26_s22 = sshll.u32 %s931_s2, 4  ;;  %s932_s26 = smov 64   ;;  %s27_s22 = int_to_ptr.vmem [resolvable:$true] %s26_s22 }
   0xa   :  { %s933_s4 = smov 4   ;;  %s934_s27 = smov [#allocation6]  }
   0xb   :  { %32 = dma.hbm_to_vmem [thread:$0]  %s25_s21, 1024, %s27_s22, [#allocation3], %s932_s26, %s932_s26, %s933_s4  }
   0xc   :  { %s50_s28 = sshll.u32 %s934_s27, 4  ;;  %s72_s30 = sshll.u32 %s1173_s5, 4  ;;  %s51_s28 = int_to_ptr.vmem [resolvable:$true] %s50_s28  ;;  %s73_s30 = int_to_ptr.hbm [resolvable:$true] %s72_s30 }
   0xd   :  { %56 = dma.hbm_to_vmem [thread:$0]  %s49_s25, 1024, %s51_s28, [#allocation5], %s932_s26, %s932_s26, %s933_s4  }
   0xe   :  { %s86_s3 = sshll.u32 %s1174_s6, 4  ;;  %s935_s12 = smov [#allocation9]   ;;  %s87_s3 = int_to_ptr.hbm [resolvable:$true] %s86_s3 }
   0xf   :  { %s74_s13 = sshll.u32 %s935_s12, 4  ;;  %s936_s14 = smov [#allocation10]   ;;  %s75_s13 = int_to_ptr.vmem [resolvable:$true] %s74_s13 }
  0x10   :  { %80 = dma.hbm_to_vmem [thread:$0]  %s73_s30, 1024, %s75_s13, [#allocation8], %s932_s26, %s932_s26, %s933_s4  }
  0x11   :  { %s88_s15 = sshll.u32 %s936_s14, 4  ;;  %s89_s15 = int_to_ptr.vmem [resolvable:$true] %s88_s15 }
  0x12   :  { %91 = dma.hbm_to_vmem [thread:$0]  %s87_s3, 16, %s89_s15, [#allocation11]  }
  0x13   :  { %921 = dma.done.wait [#allocation3], 1024  }
  0x14   :  { %922 = vsyncadd [#allocation3], 4294966272 }
  0x15   :  { %923 = dma.done.wait [#allocation5], 1040  }
  0x16   :  { %924 = vsyncadd [#allocation5], 4294966256 }
  0x17   :  { %925 = dma.done.wait [#allocation8], 1040  }
  0x18   :  { %926 = vsyncadd [#allocation8], 4294966256 }
  0x19   :  { %927 = dma.done.wait [#allocation11], 16  }
  0x1a   :  { %928 = vsyncadd [#allocation11], 4294967280  ;;  %vm161_vm0 = vcmask 1041409   ;;  %vm164_vm1 = vcmask 1042434   ;;  %vm167_vm2 = vcmask 1043459   ;;  %vm170_vm3 = vcmask 1044484  }
  0x1b   :  { %vm173_vm4 = vcmask 1045509   ;;  %vm176_vm5 = vcmask 1046534   ;;  %v128_v0 = vld [vmem:[%s1168_s0 + $0x6] sm:$0x1]  ;;  %v129_v1 = vld [vmem:[%s1168_s0 + $0x16] sm:$0x1] }
  0x1c   :  { %v130_v2 = vld [vmem:[%s1168_s0 + $0x26] sm:$0x1]  ;;  %v131_v3 = vld [vmem:[%s1168_s0 + $0x36] sm:$0x1]  ;;  %v190_v8 = vrot.slane %v129_v1, 7  ;;  %vm179_vm6 = vcmask 1047559  }
  0x1d   :  { %v132_v4 = vld [vmem:[%s1168_s0 + $0x46] sm:$0x1]  ;;  %v133_v5 = vld [vmem:[%s1168_s0 + $0x56] sm:$0x1]  ;;  %v192_v9 = vrot.slane %v130_v2, 6  ;;  %v194_v10 = vrot.slane %v131_v3, 5 }
  0x1e   :  { %v134_v6 = vld [vmem:[%s1168_s0 + $0x66] sm:$0x1]  ;;  %v135_v7 = vld [vmem:[%s1168_s0 + $0x76] sm:$0x1]  ;;  %v196_v11 = vrot.slane %v132_v4, 4  ;;  %v198_v12 = vrot.slane %v133_v5, 3  ;;  %v191_v14 = vsel %vm161_vm0, %v190_v8, %v128_v0 }
  0x1f   :  { %v136_v13 = vld [vmem:[%s1168_s0 + $0x9] sm:$0x1]  ;;  %v200_v15 = vrot.slane %v134_v6, 2  ;;  %v137_v16 = vld [vmem:[%s1168_s0 + $0x19] sm:$0x1]  ;;  %v193_v19 = vsel %vm164_vm1, %v192_v9, %v191_v14  ;;  %v202_v24 = vrot.slane %v135_v7, 1 }
  0x20   :  { %v138_v17 = vld [vmem:[%s1168_s0 + $0x29] sm:$0x1]  ;;  %v738_v18 = vld [vmem:[#allocation2 + $0x38] sm:$0xff]  ;;  %v195_v23 = vsel %vm167_vm2, %v194_v10, %v193_v19  ;;  %v215_v26 = vrot.slane %v137_v16, 7  ;;  %v144_v32 = vld [vmem:[%s1168_s0 + $0xc] sm:$0x1] }
  0x21   :  { %v139_v20 = vld [vmem:[%s1168_s0 + $0x39] sm:$0x1]  ;;  %v140_v21 = vld [vmem:[%s1168_s0 + $0x49] sm:$0x1]  ;;  %v217_v27 = vrot.slane %v138_v17, 6  ;;  %332 = vmatpush.bf16.msra.mxu0 %v738_v18  ;;  %v197_v28 = vsel %vm170_vm3, %v196_v11, %v195_v23  ;;  %v737_v33 = vld [vmem:[#allocation2 + $0x30] sm:$0xff] }
  0x22   :  { %v141_v22 = vld [vmem:[%s1168_s0 + $0x59] sm:$0x1]  ;;  %v142_v25 = vld [vmem:[%s1168_s0 + $0x69] sm:$0x1]  ;;  %v219_v30 = vrot.slane %v139_v20, 5  ;;  %v221_v31 = vrot.slane %v140_v21, 4  ;;  %v199_v34 = vsel %vm173_vm4, %v198_v12, %v197_v28  ;;  %v216_v35 = vsel %vm161_vm0, %v215_v26, %v136_v13 }
  0x23   :  { %v143_v29 = vld [vmem:[%s1168_s0 + $0x79] sm:$0x1]  ;;  %v223_v36 = vrot.slane %v141_v22, 3  ;;  %v225_v37 = vrot.slane %v142_v25, 2  ;;  %v145_v38 = vld [vmem:[%s1168_s0 + $0x1c] sm:$0x1]  ;;  %v201_v40 = vsel %vm176_vm5, %v200_v15, %v199_v34  ;;  %v218_v41 = vsel %vm164_vm1, %v217_v27, %v216_v35 }
  0x24   :  { %v146_v39 = vld [vmem:[%s1168_s0 + $0x2c] sm:$0x1]  ;;  %v147_v42 = vld [vmem:[%s1168_s0 + $0x3c] sm:$0x1]  ;;  %v203_v45 = vsel %vm179_vm6, %v202_v24, %v201_v40  ;;  %v220_v46 = vsel %vm167_vm2, %v219_v30, %v218_v41  ;;  %v240_v48 = vrot.slane %v145_v38, 7  ;;  %s937_s11 = smov 32  }
  0x25   :  { %v148_v43 = vld [vmem:[%s1168_s0 + $0x4c] sm:$0x1]  ;;  %v149_v44 = vld [vmem:[%s1168_s0 + $0x5c] sm:$0x1]  ;;  %v242_v49 = vrot.slane %v146_v39, 6  ;;  %333 = vmatpush.bf16.msra.mxu0 %v737_v33  ;;  %204 = vrot.lane.b32.xlu0 %v203_v45, %s937_s11  ;;  %v222_v50 = vsel %vm170_vm3, %v221_v31, %v220_v46  ;;  %v244_v52 = vrot.slane %v147_v42, 5 }
  0x26   :  { %v150_v47 = vld [vmem:[%s1168_s0 + $0x6c] sm:$0x1]  ;;  %v151_v51 = vld [vmem:[%s1168_s0 + $0x7c] sm:$0x1]  ;;  %v246_v53 = vrot.slane %v148_v43, 4  ;;  %v224_v55 = vsel %vm173_vm4, %v223_v36, %v222_v50  ;;  %v227_v56 = vrot.slane %v143_v29, 1  ;;  %v241_v57 = vsel %vm161_vm0, %v240_v48, %v144_v32 }
  0x27   :  { %v736_v54 = vld [vmem:[#allocation2 + $0x28] sm:$0xff]  ;;  %v248_v58 = vrot.slane %v149_v44, 3  ;;  %v226_v59 = vsel %vm176_vm5, %v225_v37, %v224_v55  ;;  %v243_v60 = vsel %vm164_vm1, %v242_v49, %v241_v57  ;;  %v250_v61 = vrot.slane %v150_v47, 2  ;;  %v735_v0 = vld [vmem:[#allocation2 + $0x20] sm:$0xff]  ;;  %v734_v6 = vld [vmem:[#allocation2 + $0x18] sm:$0xff]  ;;  %s938_s13 = smov 96  }
  0x28   :  { %v245_v62 = vsel %vm167_vm2, %v244_v52, %v243_v60  ;;  %v252_v63 = vrot.slane %v151_v51, 1  ;;  %v228_v2 = vsel %vm179_vm6, %v227_v56, %v226_v59  ;;  %v733_v7 = vld [vmem:[#allocation2 + $0x10] sm:$0xff]  ;;  %v732_v8 = vld [vmem:[#allocation2 + $0x8] sm:$0xff]  ;;  %v731_v9 = vld [vmem:[#allocation2] sm:$0xff]  ;;  %vm257_vm7 = vcmask 261120  }
  0x29   :  { %334 = vmatpush.bf16.msra.mxu0 %v736_v54  ;;  %v247_v1 = vsel %vm170_vm3, %v246_v53, %v245_v62  ;;  %v121_v10 = vld [vmem:[%s1168_s0 + $0x13] sm:$0x1]  ;;  %v746_v11 = vld [vmem:[#allocation6 + $0x38] sm:$0xff]  ;;  %v122_v12 = vld [vmem:[%s1168_s0 + $0x23] sm:$0x1]  ;;  %vm259_vm8 = vcmask 523264  }
  0x2a   :  { %v249_v3 = vsel %vm173_vm4, %v248_v58, %v247_v1  ;;  %v160_v13 = vrot.slane %v121_v10, 7  ;;  %415 = vmatpush.bf16.msra.mxu1 %v746_v11  ;;  %v745_v14 = vld [vmem:[#allocation6 + $0x30] sm:$0xff]  ;;  %v120_v15 = vld [vmem:[%s1168_s0 + $0x3] sm:$0x1]  ;;  %v163_v17 = vrot.slane %v122_v12, 6  ;;  %v744_v19 = vld [vmem:[#allocation6 + $0x28] sm:$0xff] }
  0x2b   :  { %v251_v4 = vsel %vm176_vm5, %v250_v61, %v249_v3  ;;  %v123_v16 = vld [vmem:[%s1168_s0 + $0x33] sm:$0x1]  ;;  %v124_v20 = vld [vmem:[%s1168_s0 + $0x43] sm:$0x1]  ;;  %v742_v29 = vld [vmem:[#allocation6 + $0x18] sm:$0xff]  ;;  %vm261_vm9 = vcmask 785408  }
  0x2c   :  { %v253_v5 = vsel %vm179_vm6, %v252_v63, %v251_v4  ;;  %v162_v18 = vsel %vm161_vm0, %v160_v13, %v120_v15  ;;  %v166_v21 = vrot.slane %v123_v16, 5  ;;  %v743_v23 = vld [vmem:[#allocation6 + $0x20] sm:$0xff]  ;;  %v125_v24 = vld [vmem:[%s1168_s0 + $0x53] sm:$0x1]  ;;  %v169_v25 = vrot.slane %v124_v20, 4  ;;  %v740_v45 = vld [vmem:[#allocation6 + $0x8] sm:$0xff] }
  0x2d   :  { %335 = vmatpush.bf16.msra.mxu0 %v735_v0  ;;  %229 = vrot.lane.b32.xlu0 %v228_v2, %s932_s26  ;;  %v165_v22 = vsel %vm164_vm1, %v163_v17, %v162_v18  ;;  %v126_v27 = vld [vmem:[%s1168_s0 + $0x63] sm:$0x1]  ;;  %v172_v28 = vrot.slane %v125_v24, 3  ;;  %v127_v31 = vld [vmem:[%s1168_s0 + $0x73] sm:$0x1]  ;;  %v753_v48 = vld [vmem:[#allocation9 + $0x30] sm:$0xff] }
  0x2e   :  { %254 = vrot.lane.b32.xlu1 %v253_v5, %s938_s13  ;;  %416 = vmatpush.bf16.msra.mxu1 %v745_v14  ;;  %v168_v26 = vsel %vm167_vm2, %v166_v21, %v165_v22  ;;  %v175_v32 = vrot.slane %v126_v27, 2  ;;  %v741_v34 = vld [vmem:[#allocation6 + $0x10] sm:$0xff]  ;;  %v178_v36 = vrot.slane %v127_v31, 1  ;;  %v739_v46 = vld [vmem:[#allocation6] sm:$0xff]  ;;  %v773_v53 = vld [vmem:[#allocation4] ss:$0 sm:$0xff] }
  0x2f   :  { %v171_v30 = vsel %vm170_vm3, %v169_v25, %v168_v26  ;;  %v754_v47 = vld [vmem:[#allocation9 + $0x38] sm:$0xff]  ;;  %v752_v49 = vld [vmem:[#allocation9 + $0x28] sm:$0xff]  ;;  %v751_v50 = vld [vmem:[#allocation9 + $0x20] sm:$0xff] }
  0x30   :  { %v174_v33 = vsel %vm173_vm4, %v172_v28, %v171_v30  ;;  %498 = vmatpush.bf16.msra.mxu2 %v754_v47  ;;  %v750_v51 = vld [vmem:[#allocation9 + $0x18] sm:$0xff]  ;;  %v749_v52 = vld [vmem:[#allocation9 + $0x10] sm:$0xff]  ;;  %v748_v59 = vld [vmem:[#allocation9 + $0x8] sm:$0xff] }
  0x31   :  { %336 = vmatpush.bf16.msra.mxu0 %v734_v6  ;;  %v177_v37 = vsel %vm176_vm5, %v175_v32, %v174_v33  ;;  %v747_v60 = vld [vmem:[#allocation9] sm:$0xff]  ;;  %v762_v61 = vld [vmem:[%s1175_s7 + $0x38] sm:$0xff]  ;;  %v761_v62 = vld [vmem:[%s1175_s7 + $0x30] sm:$0xff] }
  0x32   :  { %417 = vmatpush.bf16.msra.mxu1 %v744_v19  ;;  %v180_v38 = vsel %vm179_vm6, %v178_v36, %v177_v37  ;;  %581 = vmatpush.bf16.msra.mxu3 %v762_v61  ;;  %v760_v63 = vld [vmem:[%s1175_s7 + $0x28] sm:$0xff]  ;;  %v759_v0 = vld [vmem:[%s1175_s7 + $0x20] sm:$0xff]  ;;  %v758_v1 = vld [vmem:[%s1175_s7 + $0x18] sm:$0xff] }
  0x33   :  { %v757_v2 = vld [vmem:[%s1175_s7 + $0x10] sm:$0xff]  ;;  %v774_v3 = vld [vmem:[#allocation7] ss:$0 sm:$0xff]  ;;  %v775_v11 = vld [vmem:[#allocation10] ss:$0 sm:$0xff] }
  0x34   :  { %499 = vmatpush.bf16.msra.mxu2 %v753_v48  ;;  %v755_v10 = vld [vmem:[%s1175_s7] sm:$0xff] }
  0x35   :  { %337 = vmatpush.bf16.msra.mxu0 %v733_v7  ;;  %v776_v17 = vld [vmem:[%s1176_s8] ss:$0 sm:$0xff] }
  0x36   :  { %418 = vmatpush.bf16.msra.mxu1 %v743_v23  ;;  %582 = vmatpush.bf16.msra.mxu3 %v761_v62 }
  0x38   :  { %500 = vmatpush.bf16.msra.mxu2 %v752_v49 }
  0x39   :  { %338 = vmatpush.bf16.msra.mxu0 %v732_v8 }
  0x3a   :  { %419 = vmatpush.bf16.msra.mxu1 %v742_v29  ;;  %583 = vmatpush.bf16.msra.mxu3 %v760_v63 }
  0x3c   :  { %501 = vmatpush.bf16.msra.mxu2 %v751_v50 }
  0x3d   :  { %339 = vmatpush.bf16.msra.mxu0 %v731_v9  ;;  %v756_v9 = vld [vmem:[%s1175_s7 + $0x8] sm:$0xff] }
  0x3e   :  { %420 = vmatpush.bf16.msra.mxu1 %v741_v34  ;;  %584 = vmatpush.bf16.msra.mxu3 %v759_v0 }
  0x40   :  { %502 = vmatpush.bf16.msra.mxu2 %v750_v51 }
  0x42   :  { %421 = vmatpush.bf16.msra.mxu1 %v740_v45  ;;  %585 = vmatpush.bf16.msra.mxu3 %v758_v1 }
  0x44   :  { %503 = vmatpush.bf16.msra.mxu2 %v749_v52 }
  0x46   :  { %422 = vmatpush.bf16.msra.mxu1 %v739_v46  ;;  %586 = vmatpush.bf16.msra.mxu3 %v757_v2 }
  0x48   :  { %504 = vmatpush.bf16.msra.mxu2 %v748_v59 }
  0x4a   :  { %587 = vmatpush.bf16.msra.mxu3 %v756_v9 }
  0x4c   :  { %505 = vmatpush.bf16.msra.mxu2 %v747_v60 }
  0x4e   :  { %588 = vmatpush.bf16.msra.mxu3 %v755_v10 }
  0x97   :  { %v205_v35 = vpop.permute.xlu0 %204 }
  0x98   :  { %v258_v39 = vsel %vm257_vm7, %v180_v38, %v205_v35 }
  0x9f   :  { %v230_v40 = vpop.permute.xlu0 %229 }
  0xa0   :  { %v255_v41 = vpop.permute.xlu1 %254  ;;  %v260_v42 = vsel %vm259_vm8, %v258_v39, %v230_v40 }
  0xa1   :  { %v262_v43 = vsel %vm261_vm9, %v260_v42, %v255_v41 }
  0xa2   :  { %v263_v44 = vpack.c.bf16 %v262_v43, %v262_v43 }
  0xa4   :  { %340 = vmatmul.bf16.vlgmr.msra.gmra.mxu0 %v263_v44 }
 0x121   :  { %v341_v54 = vpop.f32.mrf.mxu0 }
 0x122   :  { %v342_v55 = vadd.f32 %v773_v53, %v341_v54 }
 0x124   :  { %v345_v56 = vmax.f32 %v342_v55, 0.0 }
 0x126   :  { %v346_v57 = vpack.c.bf16 %v345_v56, %v345_v56 }
 0x128   :  { %423 = vmatmul.bf16.vlgmr.msra.gmra.mxu1 %v346_v57 }
 0x129   :  { %v343_v58 = vpop.f32.mrf.mxu0 }
 0x1a5   :  { %v424_v4 = vpop.f32.mrf.mxu1 }
 0x1a6   :  { %v425_v5 = vadd.f32 %v774_v3, %v424_v4 }
 0x1a8   :  { %v428_v6 = vmax.f32 %v425_v5, 0.0 }
 0x1aa   :  { %v429_v7 = vpack.c.bf16 %v428_v6, %v428_v6 }
 0x1ac   :  { %506 = vmatmul.bf16.vlgmr.msra.gmra.mxu2 %v429_v7 }
 0x1ad   :  { %v426_v8 = vpop.f32.mrf.mxu1 }
 0x22f   :  { %v507_v12 = vpop.f32.mrf.mxu2 }
 0x230   :  { %v508_v13 = vadd.f32 %v775_v11, %v507_v12 }
 0x232   :  { %v511_v14 = vmax.f32 %v508_v13, 0.0 }
 0x234   :  { %v512_v15 = vpack.c.bf16 %v511_v14, %v511_v14 }
 0x236   :  { %589 = vmatmul.bf16.vlgmr.msra.gmra.mxu3 %v512_v15 }
 0x237   :  { %v509_v16 = vpop.f32.mrf.mxu2 }
 0x2b9   :  { %v590_v18 = vpop.f32.mrf.mxu3 }
 0x2ba   :  { %v591_v19 = vadd.f32 %v776_v17, %v590_v18 }
 0x2bc   :  { %594 = vst [vmem:[%s1177_s9] sm:$0xff] %v591_v19 }
 0x2c1   :  { %v592_v20 = vpop.f32.mrf.mxu3 }
 0x2c2   :  { %599 = vsyncpa [#allocation3], 1 }
 0x2c3   :  { %600 = vsyncpa [#allocation5], 1 }
 0x2c4   :  { %601 = vsyncpa [#allocation8], 1 }
 0x2c5   :  { %602 = vsyncpa [#allocation11], 1 }

</bundles_post_ra>
